<compile_context>
chip_gen: v7x
topology: tpu7x:2x2x1
jax: 0.10.0
libtpu: 0.0.40
codegen_flags: <defaults>
</compile_context>

<pallas_src>
import jax
import jax.numpy as jnp
from jax.experimental import pallas as pl
from jax.experimental.pallas import tpu as pltpu


# ----------------------------- sizing helpers --------------------------------

def _vmem_capacity_bytes():
    try:
        return int(pltpu.get_tpu_info().vmem_capacity_bytes)
    except Exception:
        return 64 * 1024 * 1024  # v7x physical per-TC VMEM: safe lower bound


def _pick_batch_tile(batch, vocab, budget_bytes):
    """Largest batch tile (multiple of 8 that divides `batch`) fitting VMEM."""
    # ~14 f32 (TB, V) slabs live per grid step:
    #   4 streamed inputs x 2 pipeline buffers + ~6 materialized intermediates.
    slab_bytes = 4 * vocab
    max_tb = max(8, budget_bytes // (14 * slab_bytes))
    if batch <= max_tb:
        return batch
    tb = (min(max_tb, batch) // 8) * 8
    while tb >= 8 and batch % tb:
        tb -= 8
    if tb >= 8 and batch % tb == 0:
        return tb
    return batch  # odd batch sizes: fall back to a single full-batch tile


# ----------------------------- kernel ----------------------------------------

def _kl_sum(idf_sm, pred, pqt):
    """Unreduced (sum over tile) KLDiv(log_softmax(pred), target) for one side."""
    f32 = jnp.float32

    # softmax(mask_zero_to_-inf(pqtfidf)).  TF-IDF scores are non-negative, so
    # max over the raw values equals max over the -inf-masked values, and a
    # `where` on the exp replaces the full-width -inf select + subtract.
    nz = pqt != f32(0.0)
    m = jnp.max(pqt, axis=-1, keepdims=True)
    e = jnp.where(nz, jnp.exp(pqt - m), f32(0.0))
    inv = pl.reciprocal(jnp.sum(e, axis=-1, keepdims=True), approx=False)
    pqt_sm = e * inv                                            # (TB, V)

    target = f32(0.5) * (idf_sm + pqt_sm)                       # (TB, V)

    # log_softmax of the predicted vocab distribution
    p_s = pred - jnp.max(pred, axis=-1, keepdims=True)
    logp = p_s - jnp.log(jnp.sum(jnp.exp(p_s), axis=-1, keepdims=True))

    # KLDivLoss pointwise: where(t > 0, t * (log t - logp), 0)
    t_pos = target > f32(0.0)
    logt = jnp.log(jnp.where(t_pos, target, f32(1.0)))
    return jnp.sum(jnp.where(t_pos, target * (logt - logp), f32(0.0)))


def _fused_loss_kernel(idf_ref, pp_ref, pn_ref, lbl_ref,
                       pos_ev_ref, neg_ev_ref, pos_pq_ref, neg_pq_ref,
                       out_ref):
    # idf_ref : (1, V)  precomputed softmax(idf_masked), VMEM-resident
    # pp/pn/lbl: (1, B) relevance scores / label, VMEM-resident
    # *_ev    : (TB, V) encoded_vocabs tile (pos / neg)
    # *_pq    : (TB, V) stacked pqtfidf tile (pos / neg)
    # out_ref : (1, 3)  SMEM: [pos KL partial sum, neg KL partial sum, margin MSE]
    idf_sm = idf_ref[...]
    out_ref[0, 0] = _kl_sum(idf_sm, pos_ev_ref[...], pos_pq_ref[...])
    out_ref[0, 1] = _kl_sum(idf_sm, neg_ev_ref[...], neg_pq_ref[...])
    # Margin-MSE is tiny ((1, B) elementwise); recompute it on every tile so
    # every output block is fully written (parallel-grid / megacore safe).
    diff = (pp_ref[...] - pn_ref[...]) - lbl_ref[...]
    out_ref[0, 2] = jnp.sum(diff * diff) / jnp.float32(diff.size)


# ----------------------------- wrapper ----------------------------------------

def mask_zero_2_neg_inf(x):
    return jnp.where(x == 0.0, -jnp.inf, x)


@jax.jit
def mlm_softmax_sum_pqtfidf_criterion(idf_masked,
                                      pos_encoded_vocabs, neg_encoded_vocabs,
                                      pos_pqtfidf, neg_pqtfidf,
                                      pred_pos, pred_neg, label):
    f32 = jnp.float32
    B, V = pos_encoded_vocabs.shape

    # norm_method == 'softmax' on the (already zero->-inf masked) idf parameter.
    # Batch-independent O(V); hoisted out of the per-tile kernel path entirely
    # and kept VMEM-resident inside the fused kernel.
    idf_sm = jax.nn.softmax(idf_masked.astype(f32).reshape(1, V), axis=-1)

    pp = pred_pos.astype(f32).reshape(1, B)
    pn = pred_neg.astype(f32).reshape(1, B)
    lb = label.astype(f32).reshape(1, B)

    vmem_cap = _vmem_capacity_bytes()
    vmem_limit = int(min(vmem_cap // 2, 96 * 1024 * 1024))   # leave headroom
    tb = _pick_batch_tile(B, V, vmem_limit)
    num_tiles = B // tb

    resident = lambda t: (0, 0)   # DMA'd once, stays in VMEM across the grid
    tiled = lambda t: (t, 0)

    out = pl.pallas_call(
        _fused_loss_kernel,
        out_shape=jax.ShapeDtypeStruct((num_tiles, 3), f32),
        grid=(num_tiles,),
        in_specs=[
            pl.BlockSpec((1, V), resident),    # idf softmax
            pl.BlockSpec((1, B), resident),    # pred_pos
            pl.BlockSpec((1, B), resident),    # pred_neg
            pl.BlockSpec((1, B), resident),    # label
            pl.BlockSpec((tb, V), tiled),      # pos encoded_vocabs
            pl.BlockSpec((tb, V), tiled),      # neg encoded_vocabs
            pl.BlockSpec((tb, V), tiled),      # pos pqtfidf
            pl.BlockSpec((tb, V), tiled),      # neg pqtfidf
        ],
        out_specs=pl.BlockSpec((1, 3), lambda t: (t, 0),
                               memory_space=pltpu.MemorySpace.SMEM),
        compiler_params=pltpu.CompilerParams(
            dimension_semantics=("parallel",),
            vmem_limit_bytes=vmem_limit),
    )(idf_sm,
      pp, pn, lb,
      pos_encoded_vocabs.astype(f32), neg_encoded_vocabs.astype(f32),
      pos_pqtfidf.astype(f32), neg_pqtfidf.astype(f32))

    # scales = {'margin_mse': 1}
    student_loss = f32(1.0) * out[0, 2]
    # batchmean KL for each side, summed: (sum_pos + sum_neg) / B
    map_loss = jnp.sum(out[:, :2]) / f32(B)
    return {
        "student_loss": student_loss,
        "map_loss": map_loss,
        "loss": student_loss + map_loss,
    }


# ----------------------------- demo ------------------------------------------

if __name__ == "__main__":
    B, V = 8, 512  # small batch / vocab; V is a multiple of 128 (lane width)

    key = jax.random.PRNGKey(0)
    k_idf, k_pv, k_nv, k_pq, k_nq, k_pp, k_pn, k_lb, k_z1, k_z2, k_z3 = (
        jax.random.split(key, 11)
    )

    # "parameter" init (replaces json idf file): positive idf scores with some
    # exact zeros, then zeros -> -inf as in Dense2SparseMapSoftmaxSumCriterion.__init__
    idf = jax.random.uniform(k_idf, (V,), jnp.float32, 0.0, 5.0)
    idf = idf * (jax.random.uniform(k_z1, (V,)) > 0.3).astype(jnp.float32)
    idf_masked = mask_zero_2_neg_inf(idf)

    # forward inputs
    pos_encoded_vocabs = jax.random.normal(k_pv, (B, V), jnp.float32)
    neg_encoded_vocabs = jax.random.normal(k_nv, (B, V), jnp.float32)

    # stacked pqtfidf rows (sparse, non-negative), one per batch element
    pos_pqtfidf = jax.random.uniform(k_pq, (B, V), jnp.float32, 0.1, 3.0)
    pos_pqtfidf = pos_pqtfidf * (jax.random.uniform(k_z2, (B, V)) > 0.9).astype(jnp.float32)
    neg_pqtfidf = jax.random.uniform(k_nq, (B, V), jnp.float32, 0.1, 3.0)
    neg_pqtfidf = neg_pqtfidf * (jax.random.uniform(k_z3, (B, V)) > 0.9).astype(jnp.float32)

    pred_pos = jax.random.normal(k_pp, (B,), jnp.float32)
    pred_neg = jax.random.normal(k_pn, (B,), jnp.float32)
    label = jax.random.normal(k_lb, (B,), jnp.float32)

    losses = mlm_softmax_sum_pqtfidf_criterion(
        idf_masked, pos_encoded_vocabs, neg_encoded_vocabs,
        pos_pqtfidf, neg_pqtfidf, pred_pos, pred_neg, label)
    jax.block_until_ready(losses)

    # cross-check against a plain-JAX reference of the same math
    def ref_kl(idf_m, pred, pqt):
        idf_sm = jax.nn.softmax(idf_m, axis=-1)[None, :]
        pqt_sm = jax.nn.softmax(jnp.where(pqt == 0.0, -jnp.inf, pqt), axis=-1)
        t = 0.5 * (idf_sm + pqt_sm)
        logp = jax.nn.log_softmax(pred, axis=-1)
        xlogy = jnp.where(t > 0, t * jnp.log(jnp.where(t > 0, t, 1.0)), 0.0)
        return jnp.sum(xlogy - t * logp) / pred.shape[0]

    ref_student = jnp.mean(((pred_pos - pred_neg) - label) ** 2)
    ref_map = (ref_kl(idf_masked, pos_encoded_vocabs, pos_pqtfidf)
               + ref_kl(idf_masked, neg_encoded_vocabs, neg_pqtfidf))
    assert jnp.allclose(losses["student_loss"], ref_student, rtol=1e-5, atol=1e-5)
    assert jnp.allclose(losses["map_loss"], ref_map, rtol=1e-5, atol=1e-5)
    assert jnp.allclose(losses["loss"], ref_student + ref_map, rtol=1e-5, atol=1e-5)

    print("KERNEL_OK")
</pallas_src>

<mosaic_0001>
module attributes {stable_mosaic.version = 11 : i64} {
  func.func @_fused_loss_kernel(%arg0: i32, %arg1: memref<1x512xf32, #tpu.memory_space<vmem>>, %arg2: memref<1x8xf32, #tpu.memory_space<vmem>>, %arg3: memref<1x8xf32, #tpu.memory_space<vmem>>, %arg4: memref<1x8xf32, #tpu.memory_space<vmem>>, %arg5: memref<8x512xf32, #tpu.memory_space<vmem>>, %arg6: memref<8x512xf32, #tpu.memory_space<vmem>>, %arg7: memref<8x512xf32, #tpu.memory_space<vmem>>, %arg8: memref<8x512xf32, #tpu.memory_space<vmem>>, %arg9: memref<1x3xf32, #tpu.memory_space<smem>>) attributes {dimension_semantics = [#tpu.dimension_semantics<parallel>], iteration_bounds = array<i64: 1>, scalar_prefetch = 0 : i64, scratch_operands = 0 : i64, tpu.core_type = #tpu.core_type<tc>, window_params = [{pipeline_mode = #tpu.pipeline_mode<synchronous>, transform_indices = @transform_0, window_bounds = array<i64: 1, 512>}, {pipeline_mode = #tpu.pipeline_mode<synchronous>, transform_indices = @transform_1, window_bounds = array<i64: 1, 8>}, {pipeline_mode = #tpu.pipeline_mode<synchronous>, transform_indices = @transform_2, window_bounds = array<i64: 1, 8>}, {pipeline_mode = #tpu.pipeline_mode<synchronous>, transform_indices = @transform_3, window_bounds = array<i64: 1, 8>}, {transform_indices = @transform_4, window_bounds = array<i64: 8, 512>}, {transform_indices = @transform_5, window_bounds = array<i64: 8, 512>}, {transform_indices = @transform_6, window_bounds = array<i64: 8, 512>}, {transform_indices = @transform_7, window_bounds = array<i64: 8, 512>}, {transform_indices = @transform_8, window_bounds = array<i64: 1, 3>}]} {
    %c0 = arith.constant 0 : index
    %c0_0 = arith.constant 0 : index
    %0 = vector.load %arg1[%c0, %c0_0] : memref<1x512xf32, #tpu.memory_space<vmem>>, vector<1x512xf32>
    %c0_1 = arith.constant 0 : index
    %c0_2 = arith.constant 0 : index
    %1 = vector.load %arg5[%c0_1, %c0_2] : memref<8x512xf32, #tpu.memory_space<vmem>>, vector<8x512xf32>
    %c0_3 = arith.constant 0 : index
    %c0_4 = arith.constant 0 : index
    %2 = vector.load %arg7[%c0_3, %c0_4] : memref<8x512xf32, #tpu.memory_space<vmem>>, vector<8x512xf32>
    %cst = arith.constant 0.000000e+00 : f32
    %3 = vector.broadcast %cst : f32 to vector<8x512xf32>
    %4 = arith.cmpf one, %2, %3 : vector<8x512xf32>
    %cst_5 = arith.constant dense<0xFF800000> : vector<8xf32>
    %5 = vector.multi_reduction <maximumf>, %2, %cst_5 [1] : vector<8x512xf32> to vector<8xf32>
    %6 = vector.shape_cast %5 : vector<8xf32> to vector<8x1xf32>
    %7 = vector.broadcast %6 : vector<8x1xf32> to vector<8x512xf32>
    %8 = arith.subf %2, %7 : vector<8x512xf32>
    %9 = math.exp %8 : vector<8x512xf32>
    %cst_6 = arith.constant 0.000000e+00 : f32
    %10 = vector.broadcast %cst_6 : f32 to vector<8x512xf32>
    %11 = arith.select %4, %9, %10 : vector<8x512xi1>, vector<8x512xf32>
    %cst_7 = arith.constant dense<0.000000e+00> : vector<8xf32>
    %12 = vector.multi_reduction <add>, %11, %cst_7 [1] : vector<8x512xf32> to vector<8xf32>
    %13 = vector.shape_cast %12 : vector<8xf32> to vector<8x1xf32>
    %14 = tpu.reciprocal %13 : vector<8x1xf32> -> vector<8x1xf32>
    %15 = vector.broadcast %14 : vector<8x1xf32> to vector<8x512xf32>
    %16 = arith.mulf %11, %15 : vector<8x512xf32>
    %17 = vector.broadcast %0 : vector<1x512xf32> to vector<8x512xf32>
    %18 = arith.addf %17, %16 : vector<8x512xf32>
    %cst_8 = arith.constant 5.000000e-01 : f32
    %19 = vector.broadcast %cst_8 : f32 to vector<8x512xf32>
    %20 = arith.mulf %19, %18 : vector<8x512xf32>
    %cst_9 = arith.constant dense<0xFF800000> : vector<8xf32>
    %21 = vector.multi_reduction <maximumf>, %1, %cst_9 [1] : vector<8x512xf32> to vector<8xf32>
    %22 = vector.shape_cast %21 : vector<8xf32> to vector<8x1xf32>
    %23 = vector.broadcast %22 : vector<8x1xf32> to vector<8x512xf32>
    %24 = arith.subf %1, %23 : vector<8x512xf32>
    %25 = math.exp %24 : vector<8x512xf32>
    %cst_10 = arith.constant dense<0.000000e+00> : vector<8xf32>
    %26 = vector.multi_reduction <add>, %25, %cst_10 [1] : vector<8x512xf32> to vector<8xf32>
    %27 = vector.shape_cast %26 : vector<8xf32> to vector<8x1xf32>
    %28 = math.log %27 : vector<8x1xf32>
    %29 = vector.broadcast %28 : vector<8x1xf32> to vector<8x512xf32>
    %30 = arith.subf %24, %29 : vector<8x512xf32>
    %cst_11 = arith.constant 0.000000e+00 : f32
    %31 = vector.broadcast %cst_11 : f32 to vector<8x512xf32>
    %32 = arith.cmpf ogt, %20, %31 : vector<8x512xf32>
    %cst_12 = arith.constant 1.000000e+00 : f32
    %33 = vector.broadcast %cst_12 : f32 to vector<8x512xf32>
    %34 = arith.select %32, %20, %33 : vector<8x512xi1>, vector<8x512xf32>
    %35 = math.log %34 : vector<8x512xf32>
    %36 = arith.subf %35, %30 : vector<8x512xf32>
    %37 = arith.mulf %20, %36 : vector<8x512xf32>
    %cst_13 = arith.constant 0.000000e+00 : f32
    %38 = vector.broadcast %cst_13 : f32 to vector<8x512xf32>
    %39 = arith.select %32, %37, %38 : vector<8x512xi1>, vector<8x512xf32>
    %40 = vector.shape_cast %39 : vector<8x512xf32> to vector<1x8x512xf32>
    %cst_14 = arith.constant dense<0.000000e+00> : vector<1xf32>
    %41 = vector.multi_reduction <add>, %40, %cst_14 [1, 2] : vector<1x8x512xf32> to vector<1xf32>
    %42 = vector.shape_cast %41 : vector<1xf32> to vector<1x1x1xf32>
    %43 = vector.extract %42[0, 0, 0] : f32 from vector<1x1x1xf32>
    %c0_15 = arith.constant 0 : index
    %c0_16 = arith.constant 0 : index
    %44 = memref.load %arg9[%c0_15, %c0_16] : memref<1x3xf32, #tpu.memory_space<smem>>
    memref.store %43, %arg9[%c0_15, %c0_16] : memref<1x3xf32, #tpu.memory_space<smem>>
    %c0_17 = arith.constant 0 : index
    %c0_18 = arith.constant 0 : index
    %45 = vector.load %arg6[%c0_17, %c0_18] : memref<8x512xf32, #tpu.memory_space<vmem>>, vector<8x512xf32>
    %c0_19 = arith.constant 0 : index
    %c0_20 = arith.constant 0 : index
    %46 = vector.load %arg8[%c0_19, %c0_20] : memref<8x512xf32, #tpu.memory_space<vmem>>, vector<8x512xf32>
    %cst_21 = arith.constant 0.000000e+00 : f32
    %47 = vector.broadcast %cst_21 : f32 to vector<8x512xf32>
    %48 = arith.cmpf one, %46, %47 : vector<8x512xf32>
    %cst_22 = arith.constant dense<0xFF800000> : vector<8xf32>
    %49 = vector.multi_reduction <maximumf>, %46, %cst_22 [1] : vector<8x512xf32> to vector<8xf32>
    %50 = vector.shape_cast %49 : vector<8xf32> to vector<8x1xf32>
    %51 = vector.broadcast %50 : vector<8x1xf32> to vector<8x512xf32>
    %52 = arith.subf %46, %51 : vector<8x512xf32>
    %53 = math.exp %52 : vector<8x512xf32>
    %cst_23 = arith.constant 0.000000e+00 : f32
    %54 = vector.broadcast %cst_23 : f32 to vector<8x512xf32>
    %55 = arith.select %48, %53, %54 : vector<8x512xi1>, vector<8x512xf32>
    %cst_24 = arith.constant dense<0.000000e+00> : vector<8xf32>
    %56 = vector.multi_reduction <add>, %55, %cst_24 [1] : vector<8x512xf32> to vector<8xf32>
    %57 = vector.shape_cast %56 : vector<8xf32> to vector<8x1xf32>
    %58 = tpu.reciprocal %57 : vector<8x1xf32> -> vector<8x1xf32>
    %59 = vector.broadcast %58 : vector<8x1xf32> to vector<8x512xf32>
    %60 = arith.mulf %55, %59 : vector<8x512xf32>
    %61 = vector.broadcast %0 : vector<1x512xf32> to vector<8x512xf32>
    %62 = arith.addf %61, %60 : vector<8x512xf32>
    %cst_25 = arith.constant 5.000000e-01 : f32
    %63 = vector.broadcast %cst_25 : f32 to vector<8x512xf32>
    %64 = arith.mulf %63, %62 : vector<8x512xf32>
    %cst_26 = arith.constant dense<0xFF800000> : vector<8xf32>
    %65 = vector.multi_reduction <maximumf>, %45, %cst_26 [1] : vector<8x512xf32> to vector<8xf32>
    %66 = vector.shape_cast %65 : vector<8xf32> to vector<8x1xf32>
    %67 = vector.broadcast %66 : vector<8x1xf32> to vector<8x512xf32>
    %68 = arith.subf %45, %67 : vector<8x512xf32>
    %69 = math.exp %68 : vector<8x512xf32>
    %cst_27 = arith.constant dense<0.000000e+00> : vector<8xf32>
    %70 = vector.multi_reduction <add>, %69, %cst_27 [1] : vector<8x512xf32> to vector<8xf32>
    %71 = vector.shape_cast %70 : vector<8xf32> to vector<8x1xf32>
    %72 = math.log %71 : vector<8x1xf32>
    %73 = vector.broadcast %72 : vector<8x1xf32> to vector<8x512xf32>
    %74 = arith.subf %68, %73 : vector<8x512xf32>
    %cst_28 = arith.constant 0.000000e+00 : f32
    %75 = vector.broadcast %cst_28 : f32 to vector<8x512xf32>
    %76 = arith.cmpf ogt, %64, %75 : vector<8x512xf32>
    %cst_29 = arith.constant 1.000000e+00 : f32
    %77 = vector.broadcast %cst_29 : f32 to vector<8x512xf32>
    %78 = arith.select %76, %64, %77 : vector<8x512xi1>, vector<8x512xf32>
    %79 = math.log %78 : vector<8x512xf32>
    %80 = arith.subf %79, %74 : vector<8x512xf32>
    %81 = arith.mulf %64, %80 : vector<8x512xf32>
    %cst_30 = arith.constant 0.000000e+00 : f32
    %82 = vector.broadcast %cst_30 : f32 to vector<8x512xf32>
    %83 = arith.select %76, %81, %82 : vector<8x512xi1>, vector<8x512xf32>
    %84 = vector.shape_cast %83 : vector<8x512xf32> to vector<1x8x512xf32>
    %cst_31 = arith.constant dense<0.000000e+00> : vector<1xf32>
    %85 = vector.multi_reduction <add>, %84, %cst_31 [1, 2] : vector<1x8x512xf32> to vector<1xf32>
    %86 = vector.shape_cast %85 : vector<1xf32> to vector<1x1x1xf32>
    %87 = vector.extract %86[0, 0, 0] : f32 from vector<1x1x1xf32>
    %c0_32 = arith.constant 0 : index
    %c1 = arith.constant 1 : index
    %88 = memref.load %arg9[%c0_32, %c1] : memref<1x3xf32, #tpu.memory_space<smem>>
    memref.store %87, %arg9[%c0_32, %c1] : memref<1x3xf32, #tpu.memory_space<smem>>
    %c0_33 = arith.constant 0 : index
    %c0_34 = arith.constant 0 : index
    %89 = vector.load %arg2[%c0_33, %c0_34] : memref<1x8xf32, #tpu.memory_space<vmem>>, vector<1x8xf32>
    %c0_35 = arith.constant 0 : index
    %c0_36 = arith.constant 0 : index
    %90 = vector.load %arg3[%c0_35, %c0_36] : memref<1x8xf32, #tpu.memory_space<vmem>>, vector<1x8xf32>
    %91 = arith.subf %89, %90 : vector<1x8xf32>
    %c0_37 = arith.constant 0 : index
    %c0_38 = arith.constant 0 : index
    %92 = vector.load %arg4[%c0_37, %c0_38] : memref<1x8xf32, #tpu.memory_space<vmem>>, vector<1x8xf32>
    %93 = arith.subf %91, %92 : vector<1x8xf32>
    %94 = arith.mulf %93, %93 : vector<1x8xf32>
    %95 = vector.shape_cast %94 : vector<1x8xf32> to vector<1x1x8xf32>
    %cst_39 = arith.constant dense<0.000000e+00> : vector<1xf32>
    %96 = vector.multi_reduction <add>, %95, %cst_39 [1, 2] : vector<1x1x8xf32> to vector<1xf32>
    %97 = vector.shape_cast %96 : vector<1xf32> to vector<1x1x1xf32>
    %98 = vector.extract %97[0, 0, 0] : f32 from vector<1x1x1xf32>
    %cst_40 = arith.constant 8.000000e+00 : f32
    %99 = arith.divf %98, %cst_40 : f32
    %c0_41 = arith.constant 0 : index
    %c2 = arith.constant 2 : index
    %100 = memref.load %arg9[%c0_41, %c2] : memref<1x3xf32, #tpu.memory_space<smem>>
    memref.store %99, %arg9[%c0_41, %c2] : memref<1x3xf32, #tpu.memory_space<smem>>
    return
  }
  func.func @transform_0(%arg0: i32) -> (i32, i32) {
    %c0_i32 = arith.constant 0 : i32
    %c0_i32_0 = arith.constant 0 : i32
    %c0_i32_1 = arith.constant 0 : i32
    return %c0_i32, %c0_i32_0 : i32, i32
  }
  func.func @transform_1(%arg0: i32) -> (i32, i32) {
    %c0_i32 = arith.constant 0 : i32
    %c0_i32_0 = arith.constant 0 : i32
    %c0_i32_1 = arith.constant 0 : i32
    return %c0_i32, %c0_i32_0 : i32, i32
  }
  func.func @transform_2(%arg0: i32) -> (i32, i32) {
    %c0_i32 = arith.constant 0 : i32
    %c0_i32_0 = arith.constant 0 : i32
    %c0_i32_1 = arith.constant 0 : i32
    return %c0_i32, %c0_i32_0 : i32, i32
  }
  func.func @transform_3(%arg0: i32) -> (i32, i32) {
    %c0_i32 = arith.constant 0 : i32
    %c0_i32_0 = arith.constant 0 : i32
    %c0_i32_1 = arith.constant 0 : i32
    return %c0_i32, %c0_i32_0 : i32, i32
  }
  func.func @transform_4(%arg0: i32) -> (i32, i32) {
    %c0_i32 = arith.constant 0 : i32
    %c0_i32_0 = arith.constant 0 : i32
    return %arg0, %c0_i32 : i32, i32
  }
  func.func @transform_5(%arg0: i32) -> (i32, i32) {
    %c0_i32 = arith.constant 0 : i32
    %c0_i32_0 = arith.constant 0 : i32
    return %arg0, %c0_i32 : i32, i32
  }
  func.func @transform_6(%arg0: i32) -> (i32, i32) {
    %c0_i32 = arith.constant 0 : i32
    %c0_i32_0 = arith.constant 0 : i32
    return %arg0, %c0_i32 : i32, i32
  }
  func.func @transform_7(%arg0: i32) -> (i32, i32) {
    %c0_i32 = arith.constant 0 : i32
    %c0_i32_0 = arith.constant 0 : i32
    return %arg0, %c0_i32 : i32, i32
  }
  func.func @transform_8(%arg0: i32) -> (i32, i32) {
    %c0_i32 = arith.constant 0 : i32
    %c0_i32_0 = arith.constant 0 : i32
    return %arg0, %c0_i32 : i32, i32
  }
}

</mosaic_0001>

<bundles_post_ra>
// kernel: mlm_softmax_sum_pqtfidf_criterion.1
= control target key start
LH: loop header
LB: loop body
LE: loop exit
PB: predicated region body
PF: predicated region fallthrough
CT: control target
= control target key end

     0   :  { %13 = vsyncpa [#allocation3], 0  ;;  %s782_s0 = inlined_call_operand.vmem [shape: f32[1,512], index: 0, kind: input, shape index: {}]   ;;  %s783_s1 = inlined_call_operand.vmem [shape: f32[1,8], index: 1, kind: input, shape index: {}]   ;;  %s784_s2 = inlined_call_operand.vmem [shape: f32[1,8], index: 2, kind: input, shape index: {}]   ;;  %s785_s3 = inlined_call_operand.vmem [shape: f32[1,8], index: 3, kind: input, shape index: {}]   ;;  %s786_s4 = inlined_call_operand.vmem [shape: f32[8,512], index: 4, kind: input, shape index: {}]   ;;  %s787_s5 = inlined_call_operand.hbm [shape: f32[8,512], index: 5, kind: input, shape index: {}]   ;;  %s788_s6 = inlined_call_operand.hbm [shape: f32[8,512], index: 6, kind: input, shape index: {}]   ;;  %s789_s7 = inlined_call_operand.hbm [shape: f32[8,512], index: 7, kind: input, shape index: {}]   ;;  %s790_s8 = inlined_call_operand.vmem [shape: f32[1,3], index: 8, kind: output, shape index: {}]  }
   0x1   :  { %14 = vsyncpa [#allocation6], 0 }
   0x2   :  { %15 = vsyncpa [#allocation4], 0  ;;  %s518_s27 = smov [#allocation5]   ;;  %s519_s29 = smov [#allocation2]  }
   0x3   :  { %s42_s28 = sshll.u32 %s518_s27, 4  ;;  %s32_s30 = sshll.u32 %s519_s29, 4  ;;  %s43_s28 = int_to_ptr.vmem [resolvable:$true] %s42_s28  ;;  %s33_s30 = int_to_ptr.vmem [resolvable:$true] %s32_s30 }
   0x4   :  { %s434_s11 = scalar_lea.hbm %s788_s6, 512 }
   0x5   :  { %p435_p0 = scmp.ne.s32.totalorder %s788_s6, %s434_s11  ;;  %p438_p1 = scmp.lt.u32.totalorder %s434_s11, %s788_s6 }
   0x7   :  { %p440_p2 = pnand %p438_p1, %p435_p0 }
   0x9   :  { %443 = shalt.err (!%p440_p2)
}
   0xa   :  { %s444_s16 = scalar_lea.vmem %s43_s28, 512  ;;  %p449_p4 = scmp.lt.s32.totalorder %s43_s28, %s43_s28 }
   0xb   :  { %p445_p3 = scmp.ne.s32.totalorder %s43_s28, %s444_s16  ;;  %p450_p5 = scmp.lt.s32.totalorder %s444_s16, %s444_s16 }
   0xd   :  { %p451_p6 = por %p450_p5, %p449_p4 }
   0xf   :  { %p452_p7 = pnand %p451_p6, %p445_p3 }
  0x11   :  { %455 = shalt.err (!%p452_p7)
}
  0x12   :  { %45 = dma.hbm_to_vmem [thread:$0]  %s788_s6, 512, %s43_s28, [#allocation6]  }
  0x13   :  { %s456_s21 = scalar_lea.hbm %s787_s5, 512 }
  0x14   :  { %p457_p8 = scmp.ne.s32.totalorder %s787_s5, %s456_s21  ;;  %p460_p9 = scmp.lt.u32.totalorder %s456_s21, %s787_s5 }
  0x16   :  { %p462_p10 = pnand %p460_p9, %p457_p8 }
  0x18   :  { %465 = shalt.err (!%p462_p10)
}
  0x19   :  { %s466_s26 = scalar_lea.vmem %s33_s30, 512  ;;  %p471_p12 = scmp.lt.s32.totalorder %s33_s30, %s33_s30 }
  0x1a   :  { %p467_p11 = scmp.ne.s32.totalorder %s33_s30, %s466_s26  ;;  %p472_p13 = scmp.lt.s32.totalorder %s466_s26, %s466_s26 }
  0x1c   :  { %p473_p0 = por %p472_p13, %p471_p12 }
  0x1e   :  { %p474_p1 = pnand %p473_p0, %p467_p11 }
  0x20   :  { %477 = shalt.err (!%p474_p1)
}
  0x21   :  { %35 = dma.hbm_to_vmem [thread:$0]  %s787_s5, 512, %s33_s30, [#allocation3]  }
  0x22   :  { %s520_s28 = smov [#allocation7]   ;;  %s478_s11 = scalar_lea.hbm %s789_s7, 512 }
  0x23   :  { %s52_s29 = sshll.u32 %s520_s28, 4  ;;  %p479_p2 = scmp.ne.s32.totalorder %s789_s7, %s478_s11  ;;  %s53_s29 = int_to_ptr.vmem [resolvable:$true] %s52_s29 }
  0x24   :  { %p482_p3 = scmp.lt.u32.totalorder %s478_s11, %s789_s7 }
  0x26   :  { %p484_p4 = pnand %p482_p3, %p479_p2 }
  0x28   :  { %487 = shalt.err (!%p484_p4)
}
  0x29   :  { %s488_s16 = scalar_lea.vmem %s53_s29, 512  ;;  %p493_p6 = scmp.lt.s32.totalorder %s53_s29, %s53_s29 }
  0x2a   :  { %p489_p5 = scmp.ne.s32.totalorder %s53_s29, %s488_s16  ;;  %p494_p7 = scmp.lt.s32.totalorder %s488_s16, %s488_s16 }
  0x2c   :  { %p495_p8 = por %p494_p7, %p493_p6 }
  0x2e   :  { %p496_p9 = pnand %p495_p8, %p489_p5 }
  0x30   :  { %499 = shalt.err (!%p496_p9)
}
  0x31   :  { %55 = dma.hbm_to_vmem [thread:$0]  %s789_s7, 512, %s53_s29, [#allocation6]  }
  0x32   :  { %512 = dma.done.wait [#allocation3], 512  }
  0x33   :  { %513 = vsyncadd [#allocation3], 4294966784 }
  0x34   :  { %514 = dma.done.wait [#allocation6], 1024  }
  0x35   :  { %515 = vsyncadd [#allocation6], 4294966272  ;;  %v603_v0 = vld [vmem:[#allocation5] sm:$0xff]  ;;  %v605_v1 = vld [vmem:[#allocation5 + $0x8] sm:$0xff]  ;;  %s357_s29 = sshll.u32 %s790_s8, 4  ;;  %s358_s29 = int_to_ptr.vmem [resolvable:$true] %s357_s29 }
  0x36   :  { %v607_v2 = vld [vmem:[#allocation5 + $0x10] sm:$0xff]  ;;  %v609_v3 = vld [vmem:[#allocation5 + $0x18] sm:$0xff]  ;;  %v78_v4 = vmax.f32 %v603_v0, %v605_v1  ;;  %v613_v5 = vld [vmem:[#allocation7] sm:$0xff]  ;;  %vm74_vm0 = vcmp.ne.f32.partialorder %v603_v0, 0.0  ;;  %vm75_vm1 = vcmp.ne.f32.partialorder %v605_v1, 0.0  ;;  %s500_s12 = scalar_lea.vmem %s358_s29, 16  ;;  %p505_p11 = scmp.lt.s32.totalorder %s358_s29, %s358_s29 }
  0x37   :  { %v615_v6 = vld [vmem:[#allocation7 + $0x8] sm:$0xff]  ;;  %v79_v7 = vmax.f32 %v607_v2, %v609_v3  ;;  %v619_v8 = vld [vmem:[#allocation7 + $0x10] sm:$0xff]  ;;  %v621_v9 = vld [vmem:[#allocation7 + $0x18] sm:$0xff]  ;;  %vm76_vm2 = vcmp.ne.f32.partialorder %v607_v2, 0.0  ;;  %vm216_vm3 = vcmp.ne.f32.partialorder %v613_v5, 0.0  ;;  %vm77_vm4 = vcmp.ne.f32.partialorder %v609_v3, 0.0  ;;  %p501_p10 = scmp.ne.s32.totalorder %s358_s29, %s500_s12  ;;  %p506_p12 = scmp.lt.s32.totalorder %s500_s12, %s500_s12 }
  0x38   :  { %v220_v10 = vmax.f32 %v613_v5, %v615_v6  ;;  %v66_v11 = vld [vmem:[%s786_s4] sm:$0xff]  ;;  %v221_v12 = vmax.f32 %v619_v8, %v621_v9  ;;  %v67_v13 = vld [vmem:[%s786_s4 + $0x8] sm:$0xff]  ;;  %v68_v14 = vld [vmem:[%s786_s4 + $0x10] sm:$0xff]  ;;  %vm217_vm5 = vcmp.ne.f32.partialorder %v615_v6, 0.0  ;;  %vm218_vm6 = vcmp.ne.f32.partialorder %v619_v8, 0.0 }
  0x39   :  { %v69_v15 = vld [vmem:[%s786_s4 + $0x18] sm:$0xff]  ;;  %v80_v16 = vmax.f32 %v78_v4, %v79_v7  ;;  %v138_v17 = vmax.f32 %v66_v11, %v67_v13  ;;  %v208_v19 = vld [vmem:[#allocation2] sm:$0xff]  ;;  %v209_v20 = vld [vmem:[#allocation2 + $0x8] sm:$0xff]  ;;  %vm219_vm7 = vcmp.ne.f32.partialorder %v621_v9, 0.0  ;;  %p507_p13 = por %p506_p12, %p505_p11 }
  0x3a   :  { %v139_v18 = vmax.f32 %v68_v14, %v69_v15  ;;  %v210_v21 = vld [vmem:[#allocation2 + $0x10] sm:$0xff]  ;;  %v211_v22 = vld [vmem:[#allocation2 + $0x18] sm:$0xff]  ;;  %v259_v23 = vmax.f32 %v208_v19, %v209_v20  ;;  %v222_v24 = vmax.f32 %v220_v10, %v221_v12 }
  0x3b   :  { %81 = vmax.xlane.f32.xlu0 %v80_v16  ;;  %v260_v26 = vmax.f32 %v210_v21, %v211_v22  ;;  %p508_p0 = pnand %p507_p13, %p501_p10 }
  0x3c   :  { %v140_v25 = vmax.f32 %v138_v17, %v139_v18 }
  0x3d   :  { %v261_v27 = vmax.f32 %v259_v23, %v260_v26 }
  0x3e   :  { %141 = vmax.xlane.f32.xlu1 %v140_v25 }
  0x3f   :  { %223 = vmax.xlane.f32.xlu0 %v222_v24 }
  0x42   :  { %262 = vmax.xlane.f32.xlu1 %v261_v27 }
  0xc8   :  { %v82_v28 = vpop.xlane.xlu0 %81 }
  0xc9   :  { %v83_v29 = vsub.f32 %v603_v0, %v82_v28  ;;  %v84_v30 = vsub.f32 %v605_v1, %v82_v28  ;;  %v85_v31 = vsub.f32 %v607_v2, %v82_v28  ;;  %v86_v32 = vsub.f32 %v609_v3, %v82_v28 }
  0xcb   :  { %v142_v33 = vpop.xlane.xlu1 %141  ;;  %v87_v34 = vmul.f32 1.442695, %v83_v29  ;;  %v89_v35 = vmul.f32 1.442695, %v84_v30  ;;  %v91_v36 = vmul.f32 1.442695, %v85_v31 }
  0xcc   :  { %v93_v37 = vmul.f32 1.442695, %v86_v32  ;;  %v224_v38 = vpop.xlane.xlu0 %223  ;;  %v643_v39 = vsub.f32 %v66_v11, %v142_v33  ;;  %v649_v44 = vsub.f32 %v67_v13, %v142_v33  ;;  %v651_v45 = vsub.f32 %v68_v14, %v142_v33 }
  0xcd   :  { %378 = vpow2.f32 %v87_v34  ;;  %v225_v40 = vsub.f32 %v613_v5, %v224_v38  ;;  %v226_v41 = vsub.f32 %v615_v6, %v224_v38  ;;  %v227_v42 = vsub.f32 %v619_v8, %v224_v38 }
  0xce   :  { %380 = vpow2.f32 %v89_v35  ;;  %v228_v43 = vsub.f32 %v621_v9, %v224_v38  ;;  %v653_v51 = vsub.f32 %v69_v15, %v142_v33  ;;  %v147_v52 = vmul.f32 1.442695, %v643_v39 }
  0xcf   :  { %v263_v46 = vpop.xlane.xlu1 %262  ;;  %382 = vpow2.f32 %v91_v36  ;;  %v229_v47 = vmul.f32 1.442695, %v225_v40  ;;  %v231_v48 = vmul.f32 1.442695, %v226_v41  ;;  %v233_v49 = vmul.f32 1.442695, %v227_v42 }
  0xd0   :  { %384 = vpow2.f32 %v93_v37  ;;  %v235_v50 = vmul.f32 1.442695, %v228_v43  ;;  %v656_v53 = vsub.f32 %v208_v19, %v263_v46  ;;  %v149_v54 = vmul.f32 1.442695, %v649_v44 }
  0xd1   :  { %386 = vpow2.f32 %v229_v47  ;;  %v659_v55 = vsub.f32 %v209_v20, %v263_v46  ;;  %v151_v56 = vmul.f32 1.442695, %v651_v45  ;;  %v662_v57 = vsub.f32 %v210_v21, %v263_v46 }
  0xd2   :  { %388 = vpow2.f32 %v231_v48  ;;  %v153_v58 = vmul.f32 1.442695, %v653_v51  ;;  %v665_v59 = vsub.f32 %v211_v22, %v263_v46  ;;  %v268_v60 = vmul.f32 1.442695, %v656_v53  ;;  %v65_v46 = vld [vmem:[%s782_s0] sm:$0xf] }
  0xd3   :  { %390 = vpow2.f32 %v233_v49  ;;  %v270_v61 = vmul.f32 1.442695, %v659_v55  ;;  %v272_v63 = vmul.f32 1.442695, %v662_v57  ;;  %v110_v36 = vlaneseq }
  0xd4   :  { %392 = vpow2.f32 %v235_v50  ;;  %v274_v7 = vmul.f32 1.442695, %v665_v59 }
  0xd5   :  { %394 = vpow2.f32 %v147_v52  ;;  %v111_v38 = vshrl.u32 %v110_v36, 7  ;;  %v330_v36 = vld [vmem:[%s784_s2] sm:$0x1] }
  0xd6   :  { %396 = vpow2.f32 %v149_v54 }
  0xd7   :  { %v379_v62 = vpop.eup %378  ;;  %398 = vpow2.f32 %v151_v56  ;;  %v112_v41 = vsub.s32 0, %v111_v38  ;;  %v116_v42 = vsub.s32 1, %v111_v38  ;;  %v120_v43 = vsub.s32 2, %v111_v38 }
  0xd8   :  { %v381_v4 = vpop.eup %380  ;;  %400 = vpow2.f32 %v153_v58  ;;  %v674_v10 = vsel %vm74_vm0, %v379_v62, 0.0  ;;  %v124_v47 = vsub.s32 3, %v111_v38  ;;  %vm335_vm0 = vcmask 57344  }
  0xd9   :  { %v383_v0 = vpop.eup %382  ;;  %402 = vpow2.f32 %v268_v60  ;;  %v676_v11 = vsel %vm75_vm1, %v381_v4, 0.0  ;;  %v113_v49 = vrot.slane %v65_v46, %v112_v41  ;;  %v117_v50 = vrot.slane %v65_v46, %v116_v42 }
  0xda   :  { %v385_v1 = vpop.eup %384  ;;  %404 = vpow2.f32 %v270_v61  ;;  %v99_v12 = vadd.f32 %v676_v11, %v674_v10  ;;  %v97_v2 = vsel %vm76_vm2, %v383_v0, 0.0  ;;  %v121_v52 = vrot.slane %v65_v46, %v120_v43 }
  0xdb   :  { %v387_v13 = vpop.eup %386  ;;  %406 = vpow2.f32 %v272_v63  ;;  %v98_v5 = vsel %vm77_vm4, %v385_v1, 0.0  ;;  %v125_v56 = vrot.slane %v65_v46, %v124_v47 }
  0xdc   :  { %v389_v14 = vpop.eup %388  ;;  %408 = vpow2.f32 %v274_v7  ;;  %v100_v15 = vadd.f32 %v99_v12, %v97_v2  ;;  %v237_v16 = vsel %vm216_vm3, %v387_v13, 0.0 }
  0xdd   :  { %v391_v17 = vpop.eup %390  ;;  %v238_v18 = vsel %vm217_vm5, %v389_v14, 0.0 }
  0xde   :  { %v393_v19 = vpop.eup %392  ;;  %v101_v20 = vadd.f32 %v100_v15, %v98_v5  ;;  %v241_v3 = vadd.f32 %v238_v18, %v237_v16  ;;  %v239_v22 = vsel %vm218_vm6, %v391_v17, 0.0 }
  0xdf   :  { %v395_v21 = vpop.eup %394  ;;  %v240_v25 = vsel %vm219_vm7, %v393_v19, 0.0 }
  0xe0   :  { %v397_v6 = vpop.eup %396  ;;  %102 = vadd.xlane.f32.xlu0 %v101_v20  ;;  %v242_v23 = vadd.f32 %v241_v3, %v239_v22 }
  0xe1   :  { %v399_v24 = vpop.eup %398  ;;  %v155_v26 = vadd.f32 %v397_v6, %v395_v21 }
  0xe2   :  { %v401_v27 = vpop.eup %400  ;;  %v243_v28 = vadd.f32 %v242_v23, %v240_v25 }
  0xe3   :  { %v403_v8 = vpop.eup %402  ;;  %v156_v29 = vadd.f32 %v399_v24, %v155_v26 }
  0xe4   :  { %v405_v30 = vpop.eup %404  ;;  %244 = vadd.xlane.f32.xlu1 %v243_v28 }
  0xe5   :  { %v407_v31 = vpop.eup %406  ;;  %v157_v32 = vadd.f32 %v401_v27, %v156_v29  ;;  %v276_v33 = vadd.f32 %v405_v30, %v403_v8 }
  0xe6   :  { %v409_v34 = vpop.eup %408 }
  0xe7   :  { %158 = vadd.xlane.f32.xlu0 %v157_v32  ;;  %v277_v9 = vadd.f32 %v407_v31, %v276_v33 }
  0xe9   :  { %v278_v35 = vadd.f32 %v409_v34, %v277_v9 }
  0xeb   :  { %279 = vadd.xlane.f32.xlu1 %v278_v35  ;;  %v329_v35 = vld [vmem:[%s783_s1] sm:$0x1] }
 0x16d   :  { %v103_v37 = vpop.xlane.xlu0 %102 }
 0x16e   :  { %410 = vrcp.f32 %v103_v37 }
 0x171   :  { %v245_v40 = vpop.xlane.xlu1 %244 }
 0x172   :  { %412 = vrcp.f32 %v245_v40 }
 0x174   :  { %v159_v48 = vpop.xlane.xlu0 %158 }
 0x175   :  { %414 = vlog2.f32 %v159_v48  ;;  %v331_v48 = vsub.f32 %v329_v35, %v330_v36 }
 0x178   :  { %v411_v54 = vpop.eup %410 }
 0x179   :  { %v105_v58 = vmul.f32 %v411_v54, %v674_v10  ;;  %v106_v60 = vmul.f32 %v411_v54, %v676_v11  ;;  %v107_v61 = vmul.f32 %v411_v54, %v97_v2  ;;  %v108_v62 = vmul.f32 %v411_v54, %v98_v5  ;;  %v280_v11 = vpop.xlane.xlu1 %279 }
 0x17b   :  { %v130_v63 = vadd.f32 %v113_v49, %v105_v58  ;;  %v131_v4 = vadd.f32 %v117_v50, %v106_v60  ;;  %v132_v7 = vadd.f32 %v121_v52, %v107_v61  ;;  %v133_v1 = vadd.f32 %v125_v56, %v108_v62 }
 0x17c   :  { %v413_v0 = vpop.eup %412 }
 0x17d   :  { %v690_v12 = vmul.f32 0.5, %v130_v63  ;;  %v692_v13 = vmul.f32 0.5, %v131_v4  ;;  %v694_v14 = vmul.f32 0.5, %v132_v7  ;;  %v247_v15 = vmul.f32 %v413_v0, %v237_v16 }
 0x17e   :  { %v696_v17 = vmul.f32 0.5, %v133_v1  ;;  %v248_v19 = vmul.f32 %v413_v0, %v238_v18  ;;  %v249_v10 = vmul.f32 %v413_v0, %v239_v22  ;;  %v250_v20 = vmul.f32 %v413_v0, %v240_v25 }
 0x17f   :  { %vm166_vm8 = vcmp.gt.f32.partialorder %v690_v12, 0.0  ;;  %vm167_vm9 = vcmp.gt.f32.partialorder %v692_v13, 0.0  ;;  %vm168_vm10 = vcmp.gt.f32.partialorder %v694_v14, 0.0  ;;  %v251_v2 = vadd.f32 %v247_v15, %v113_v49  ;;  %v415_v22 = vpop.eup %414 }
 0x180   :  { %vm169_vm11 = vcmp.gt.f32.partialorder %v696_v17, 0.0  ;;  %v170_v5 = vsel %vm166_vm8, %v690_v12, 1.0  ;;  %v171_v16 = vsel %vm167_vm9, %v692_v13, 1.0  ;;  %v172_v18 = vsel %vm168_vm10, %v694_v14, 1.0 }
 0x181   :  { %416 = vlog2.f32 %v170_v5  ;;  %v252_v3 = vadd.f32 %v248_v19, %v117_v50  ;;  %v173_v21 = vsel %vm169_vm11, %v696_v17, 1.0  ;;  %v253_v6 = vadd.f32 %v249_v10, %v121_v52 }
 0x182   :  { %418 = vlog2.f32 %v280_v11  ;;  %v254_v23 = vadd.f32 %v250_v20, %v125_v56  ;;  %v714_v24 = vmul.f32 0.5, %v251_v2  ;;  %v161_v28 = vmul.f32 0.6931472, %v415_v22  ;;  %v332_v56 = vld [vmem:[%s785_s3] sm:$0x1] }
 0x183   :  { %420 = vlog2.f32 %v171_v16  ;;  %v716_v25 = vmul.f32 0.5, %v252_v3  ;;  %v718_v26 = vmul.f32 0.5, %v253_v6  ;;  %v333_v7 = vsub.f32 %v331_v48, %v332_v56 }
 0x184   :  { %422 = vlog2.f32 %v172_v18  ;;  %v720_v27 = vmul.f32 0.5, %v254_v23  ;;  %vm287_vm12 = vcmp.gt.f32.partialorder %v714_v24, 0.0  ;;  %v162_v34 = vsub.f32 %v643_v39, %v161_v28 }
 0x185   :  { %424 = vlog2.f32 %v173_v21  ;;  %vm288_vm13 = vcmp.gt.f32.partialorder %v716_v25, 0.0  ;;  %vm289_vm14 = vcmp.gt.f32.partialorder %v718_v26, 0.0  ;;  %v291_v8 = vsel %vm287_vm12, %v714_v24, 1.0 }
 0x186   :  { %vm290_vm15 = vcmp.gt.f32.partialorder %v720_v27, 0.0  ;;  %v292_v29 = vsel %vm288_vm13, %v716_v25, 1.0  ;;  %v293_v30 = vsel %vm289_vm14, %v718_v26, 1.0  ;;  %426 = vlog2.f32 %v291_v8 }
 0x187   :  { %v294_v31 = vsel %vm290_vm15, %v720_v27, 1.0  ;;  %428 = vlog2.f32 %v292_v29  ;;  %v163_v40 = vsub.f32 %v649_v44, %v161_v28  ;;  %v164_v47 = vsub.f32 %v651_v45, %v161_v28 }
 0x188   :  { %430 = vlog2.f32 %v293_v30  ;;  %v165_v49 = vsub.f32 %v653_v51, %v161_v28 }
 0x189   :  { %432 = vlog2.f32 %v294_v31 }
 0x18b   :  { %v417_v32 = vpop.eup %416 }
 0x18c   :  { %v419_v33 = vpop.eup %418  ;;  %v175_v9 = vmul.f32 0.6931472, %v417_v32 }
 0x18d   :  { %v421_v37 = vpop.eup %420  ;;  %v282_v46 = vmul.f32 0.6931472, %v419_v33 }
 0x18e   :  { %v423_v38 = vpop.eup %422  ;;  %v177_v41 = vmul.f32 0.6931472, %v421_v37  ;;  %v182_v42 = vsub.f32 %v175_v9, %v162_v34 }
 0x18f   :  { %v425_v43 = vpop.eup %424  ;;  %v179_v39 = vmul.f32 0.6931472, %v423_v38  ;;  %v283_v63 = vsub.f32 %v656_v53, %v282_v46  ;;  %v284_v1 = vsub.f32 %v659_v55, %v282_v46  ;;  %v286_v16 = vsub.f32 %v665_v59, %v282_v46 }
 0x190   :  { %v181_v50 = vmul.f32 0.6931472, %v425_v43  ;;  %v183_v52 = vsub.f32 %v177_v41, %v163_v40  ;;  %v186_v54 = vmul.f32 %v182_v42, %v690_v12  ;;  %v427_v44 = vpop.eup %426  ;;  %v285_v12 = vsub.f32 %v662_v57, %v282_v46 }
 0x191   :  { %v184_v58 = vsub.f32 %v179_v39, %v164_v47  ;;  %v429_v62 = vpop.eup %428  ;;  %v296_v4 = vmul.f32 0.6931472, %v427_v44  ;;  %v334_v57 = vmul.f32 %v333_v7, %v333_v7 }
 0x192   :  { %v185_v60 = vsub.f32 %v181_v50, %v165_v49  ;;  %v187_v61 = vmul.f32 %v183_v52, %v692_v13  ;;  %v190_v45 = vsel %vm166_vm8, %v186_v54, 0.0  ;;  %v431_v0 = vpop.eup %430  ;;  %v298_v10 = vmul.f32 0.6931472, %v429_v62 }
 0x193   :  { %v188_v51 = vmul.f32 %v184_v58, %v694_v14  ;;  %v433_v20 = vpop.eup %432  ;;  %v300_v2 = vmul.f32 0.6931472, %v431_v0  ;;  %v303_v5 = vsub.f32 %v296_v4, %v283_v63  ;;  %v336_v31 = vsel %vm335_vm0, %v334_v57, 0.0 }
 0x194   :  { %v189_v15 = vmul.f32 %v185_v60, %v696_v17  ;;  %v191_v19 = vsel %vm167_vm9, %v187_v61, 0.0  ;;  %v302_v18 = vmul.f32 0.6931472, %v433_v20  ;;  %v304_v3 = vsub.f32 %v298_v10, %v284_v1 }
 0x195   :  { %v194_v11 = vadd.f32 %v191_v19, %v190_v45  ;;  %v192_v53 = vsel %vm168_vm10, %v188_v51, 0.0  ;;  %v305_v21 = vsub.f32 %v300_v2, %v285_v12  ;;  %v307_v22 = vmul.f32 %v303_v5, %v714_v24 }
 0x196   :  { %v193_v13 = vsel %vm169_vm11, %v189_v15, 0.0  ;;  %v306_v6 = vsub.f32 %v302_v18, %v286_v16  ;;  %v308_v23 = vmul.f32 %v304_v3, %v716_v25 }
 0x197   :  { %v195_v55 = vadd.f32 %v194_v11, %v192_v53  ;;  %v309_v8 = vmul.f32 %v305_v21, %v718_v26  ;;  %v311_v14 = vsel %vm287_vm12, %v307_v22, 0.0 }
 0x198   :  { %v310_v59 = vmul.f32 %v306_v6, %v720_v27  ;;  %v312_v29 = vsel %vm288_vm13, %v308_v23, 0.0 }
 0x199   :  { %v196_v28 = vadd.f32 %v195_v55, %v193_v13  ;;  %v315_v30 = vadd.f32 %v312_v29, %v311_v14  ;;  %v313_v17 = vsel %vm289_vm14, %v309_v8, 0.0 }
 0x19a   :  { %v314_v33 = vsel %vm290_vm15, %v310_v59, 0.0 }
 0x19b   :  { %197 = vadd.xlane.f32.xlu0 %v196_v28  ;;  %v316_v32 = vadd.f32 %v315_v30, %v313_v17 }
 0x19d   :  { %v317_v34 = vadd.f32 %v316_v32, %v314_v33 }
 0x19f   :  { %337 = vadd.xlane.f32.xlu0 %v336_v31  ;;  %318 = vadd.xlane.f32.xlu1 %v317_v34 }
 0x228   :  { %v198_v24 = vpop.xlane.xlu0 %197 }
 0x229   :  { %v199_v9 = vrot.slane %v198_v24, 4 }
 0x22b   :  { %v200_v35 = vadd.f32 %v199_v9, %v198_v24 }
 0x22c   :  { %v338_v36 = vpop.xlane.xlu0 %337  ;;  %v319_v38 = vpop.xlane.xlu1 %318 }
 0x22d   :  { %v201_v37 = vrot.slane %v200_v35, 2  ;;  %v339_v25 = vrot.slane %v338_v36, 4  ;;  %v320_v40 = vrot.slane %v319_v38, 4 }
 0x22f   :  { %v340_v41 = vadd.f32 %v339_v25, %v338_v36  ;;  %v202_v42 = vadd.f32 %v201_v37, %v200_v35  ;;  %v321_v26 = vadd.f32 %v320_v40, %v319_v38 }
 0x231   :  { %v341_v43 = vrot.slane %v340_v41, 2  ;;  %v203_v46 = vrot.slane %v202_v42, 1  ;;  %v322_v47 = vrot.slane %v321_v26, 2 }
 0x233   :  { %v342_v39 = vadd.f32 %v341_v43, %v340_v41  ;;  %v204_v27 = vadd.f32 %v203_v46, %v202_v42  ;;  %v323_v48 = vadd.f32 %v322_v47, %v321_v26 }
 0x235   :  { %368 = vpush %v204_v27  ;;  %v343_v49 = vrot.slane %v342_v39, 1  ;;  %v324_v50 = vrot.slane %v323_v48, 1 }
 0x237   :  { %v344_v52 = vadd.f32 %v343_v49, %v342_v39  ;;  %v325_v54 = vadd.f32 %v324_v50, %v323_v48 }
 0x239   :  { %370 = vpush %v325_v54 }
 0x23a   :  { %372 = vpush %v344_v52 }
 0x266   :  { %s369_s3 = spop %368 }
 0x267   :  { %207 = sst [smem:[#allocation8]] %s369_s3 }
 0x26a   :  { %s371_s9 = spop %370 }
 0x26b   :  { %328 = sst [smem:[#allocation8 + $0x1]] %s371_s9  ;;  %s373_s10 = spop %372 }
 0x26c   :  { %s348_s11 = smul.f32 0.125, %s373_s10 }
 0x26e   :  { %350 = sst [smem:[#allocation8 + $0x2]] %s348_s11 }
 0x26f   :  { %511 = shalt.err (!%p508_p0)
}
 0x270   :  { %s521_s13 = smov [#allocation8]  }
 0x271   :  { %360 = dma.smem_to_vmem %s521_s13, 16, %s358_s29, [#allocation4]  }
 0x272   :  { %516 = dma.done.wait [#allocation4], 16  }
 0x273   :  { %517 = vsyncadd [#allocation4], 4294967280 }
 0x274   :  { %364 = sfence }
 0x275   :  { %365 = vsyncpa [#allocation3], 1 }
 0x276   :  { %366 = vsyncpa [#allocation6], 1 }
 0x277   :  { %367 = vsyncpa [#allocation4], 1 }

</bundles_post_ra>
